<compile_context>
chip_gen: v7x
topology: tpu7x:2x2x1
jax: 0.10.0
libtpu: 0.0.40
codegen_flags: <defaults>
</compile_context>

<pallas_src>
import functools

import jax
import jax.numpy as jnp
from jax.experimental import pallas as pl
from jax.experimental.pallas import tpu as pltpu

_LANE = 128
_SMALL_INPUT_BYTES = 512 * 1024  # below this, XLA's fused multiply wins


def _scale_kernel(scale_ref, x_ref, o_ref):
    # scale_ref: SMEM (1,) float32 (scalar prefetch); x_ref/o_ref: VMEM tiles.
    # Multiply in f32 and cast only the store, so bf16 inputs don't get a
    # double-rounded scale and the math matches `x * scale` in the reference.
    s = scale_ref[0]
    o_ref[...] = (x_ref[...].astype(jnp.float32) * s).astype(o_ref.dtype)


def _ceil_div(a: int, b: int) -> int:
    return -(-a // b)


@functools.lru_cache(maxsize=1)
def _chip_profile():
    """Generation-aware tiling parameters."""
    kind = ""
    try:
        kind = jax.devices()[0].device_kind.lower()
    except Exception:  # pragma: no cover - defensive
        pass
    if "v7" in kind or "7x" in kind:
        # v7x: 64 MiB VMEM per TensorCore, 2 TensorCores per chip.
        # Keep double-buffered in+out (2*2*block) well under the 32 MiB limit.
        return {
            "target_block_bytes": 6 * 1024 * 1024,
            "vmem_limit_bytes": 32 * 1024 * 1024,
            "num_tc": 2,
        }
    # v5e / v6e (and default): 128 MiB VMEM, 1 TensorCore per chip.
    return {
        "target_block_bytes": 12 * 1024 * 1024,
        "vmem_limit_bytes": 64 * 1024 * 1024,
        "num_tc": 1,
    }


def _xla_scale(x, scale, out_dtype):
    # Single fused elementwise pass (1 HBM read + 1 write); used for tiny
    # inputs and ragged (numel % 128 != 0) tails where padding would cost
    # extra full HBM passes.
    return (x.astype(jnp.float32) * scale.astype(jnp.float32)[0]).astype(out_dtype)


def scale_layer(x: jax.Array, scale: jax.Array, *, force_kernel: bool = False,
                donate_x: bool = False) -> jax.Array:
    """Computes x * scale (scale is a shape-(1,) parameter), like ScaleLayer."""
    orig_shape = x.shape
    dtype = x.dtype
    n = x.size
    if n == 0:
        return x
    itemsize = jnp.dtype(dtype).itemsize

    # Small-input bypass: fixed pallas_call / pipeline setup dominates here.
    if not force_kernel and n * itemsize < _SMALL_INPUT_BYTES:
        return _xla_scale(x, scale, dtype)

    # Ragged tail: avoid pad + final slice (each a full extra HBM pass).
    if n % _LANE != 0:
        return _xla_scale(x, scale, dtype)

    # --- Lane-dense 2-D slab (pure reshape, no HBM copy) -------------------
    width = _LANE
    for w in (2048, 1024, 512, 256):
        if n % w == 0:
            width = w
            break
    rows = n // width
    x2d = x.reshape(rows, width)

    prof = _chip_profile()
    num_tc = prof["num_tc"]
    sublane = max(8, 32 // itemsize)  # 8 for f32, 16 for bf16, 32 for int8/fp8
    max_block_rows = max(
        sublane,
        (prof["target_block_bytes"] // (width * itemsize)) // sublane * sublane,
    )

    # --- Block sizing -------------------------------------------------------
    if rows <= sublane:
        # Tiny slab: one full-extent block (allowed even if not 8-divisible).
        block_rows, grid_rows = rows, 1
    elif num_tc == 1:
        # Single TensorCore (v5e/v6e): grid is a serial loop -> biggest block
        # that fits; split only when the slab exceeds the target block size.
        if rows <= max_block_rows:
            block_rows, grid_rows = rows, 1
        else:
            block_rows = max_block_rows
            grid_rows = _ceil_div(rows, block_rows)
    else:
        # v7x (2 TensorCores): even number of near-equal blocks so both cores
        # get balanced work.
        nblk = max(num_tc, _ceil_div(rows, max_block_rows))
        nblk = _ceil_div(nblk, num_tc) * num_tc
        block_rows = _ceil_div(_ceil_div(rows, nblk), sublane) * sublane
        grid_rows = _ceil_div(rows, block_rows)

    extra_kwargs = {}
    if donate_x:
        # x is operand index 1 (after the scalar-prefetch arg); output index 0.
        extra_kwargs["input_output_aliases"] = {1: 0}

    # TODO(synk): if an xprof trace shows exposed input DMA, add
    # pipeline_mode=pl.Buffered(3) to the input BlockSpec (fits VMEM budget on
    # v5e/v6e; re-check the 64 MiB/TC budget on v7x first).
    # TODO(synk): on v7x, verify "parallel" core-shards the grid; if not,
    # switch to pltpu.CORE_PARALLEL.
    out2d = pl.pallas_call(
        _scale_kernel,
        out_shape=jax.ShapeDtypeStruct((rows, width), dtype),
        grid_spec=pltpu.PrefetchScalarGridSpec(
            num_scalar_prefetch=1,  # scale lands in SMEM
            grid=(grid_rows,),
            in_specs=[pl.BlockSpec((block_rows, width), lambda i, s_ref: (i, 0))],
            out_specs=pl.BlockSpec((block_rows, width), lambda i, s_ref: (i, 0)),
        ),
        compiler_params=pltpu.CompilerParams(
            dimension_semantics=("parallel",),
            vmem_limit_bytes=prof["vmem_limit_bytes"],
        ),
        **extra_kwargs,
    )(scale.astype(jnp.float32), x2d)

    return out2d.reshape(orig_shape)


if __name__ == "__main__":
    key = jax.random.PRNGKey(0)
    # Small NCHW input consistent with an elementwise module: (2, 4, 16, 16).
    x = jax.random.normal(key, (2, 4, 16, 16), dtype=jnp.float32)

    # Default parameter init from the module: init_value=1 -> scale = [1.0].
    scale = jnp.array([1.0], dtype=jnp.float32)
    out = scale_layer(x, scale, force_kernel=True)  # exercise the Pallas kernel
    jax.block_until_ready(out)
    assert out.shape == x.shape and out.dtype == x.dtype
    assert jnp.allclose(out, x * scale, atol=1e-6, rtol=1e-6)

    # Non-trivial scale so the multiply is actually exercised.
    scale2 = jnp.array([0.5], dtype=jnp.float32)
    out2 = scale_layer(x, scale2, force_kernel=True)
    jax.block_until_ready(out2)
    assert jnp.allclose(out2, x * scale2, atol=1e-6, rtol=1e-6)

    # Default (auto) path: small input takes the XLA bypass; must agree.
    out3 = scale_layer(x, scale2)
    jax.block_until_ready(out3)
    assert jnp.allclose(out3, out2, atol=1e-6, rtol=1e-6)

    # Medium input (16 MiB) to exercise the multi-block / masked-last-block
    # path of the kernel (grid_rows > 1 on v5e/v6e/v7x).
    x_big = jax.random.normal(jax.random.PRNGKey(1), (4096, 1024), dtype=jnp.float32)
    out_big = scale_layer(x_big, scale2)
    jax.block_until_ready(out_big)
    assert out_big.shape == x_big.shape and out_big.dtype == x_big.dtype
    assert jnp.allclose(out_big, x_big * scale2, atol=1e-6, rtol=1e-6)

    print("KERNEL_OK")
</pallas_src>

<mosaic_0001>
module attributes {stable_mosaic.version = 11 : i64} {
  func.func @_scale_kernel(%arg0: i32, %arg1: memref<1xf32, #tpu.memory_space<smem>>, %arg2: memref<1x2048xf32, #tpu.memory_space<vmem>>, %arg3: memref<1x2048xf32, #tpu.memory_space<vmem>>) attributes {dimension_semantics = [#tpu.dimension_semantics<parallel>], iteration_bounds = array<i64: 1>, scalar_prefetch = 1 : i64, scratch_operands = 0 : i64, tpu.core_type = #tpu.core_type<tc>, window_params = [{transform_indices = @transform_0, window_bounds = array<i64: 1, 2048>}, {transform_indices = @transform_1, window_bounds = array<i64: 1, 2048>}]} {
    %c0 = arith.constant 0 : index
    %0 = memref.load %arg1[%c0] : memref<1xf32, #tpu.memory_space<smem>>
    %c0_0 = arith.constant 0 : index
    %c0_1 = arith.constant 0 : index
    %1 = vector.load %arg2[%c0_0, %c0_1] : memref<1x2048xf32, #tpu.memory_space<vmem>>, vector<1x2048xf32>
    %2 = vector.broadcast %0 : f32 to vector<1x2048xf32>
    %3 = arith.mulf %1, %2 : vector<1x2048xf32>
    %c0_2 = arith.constant 0 : index
    %c0_3 = arith.constant 0 : index
    %4 = vector.load %arg3[%c0_2, %c0_3] : memref<1x2048xf32, #tpu.memory_space<vmem>>, vector<1x2048xf32>
    tpu.vector_store %arg3[%c0_2, %c0_3], %3 {strides = array<i32>} : memref<1x2048xf32, #tpu.memory_space<vmem>>, vector<1x2048xf32>,
    return
  }
  func.func @transform_0(%arg0: i32, %arg1: memref<1xf32, #tpu.memory_space<smem>>) -> (i32, i32) {
    %c0_i32 = arith.constant 0 : i32
    %c0_i32_0 = arith.constant 0 : i32
    return %arg0, %c0_i32 : i32, i32
  }
  func.func @transform_1(%arg0: i32, %arg1: memref<1xf32, #tpu.memory_space<smem>>) -> (i32, i32) {
    %c0_i32 = arith.constant 0 : i32
    %c0_i32_0 = arith.constant 0 : i32
    return %arg0, %c0_i32 : i32, i32
  }
}

</mosaic_0001>

<bundles_post_ra>
// kernel: tpu_custom_call.1
= control target key start
LH: loop header
LB: loop body
LE: loop exit
PB: predicated region body
PF: predicated region fallthrough
CT: control target
= control target key end

     0   :  { %8 = vsyncpa [#allocation5], 0  ;;  %s140_s0 = inlined_call_operand.<no memory space> [shape: f32[1], index: 0, kind: input, shape index: {}]   ;;  %s141_s1 = inlined_call_operand.hbm [shape: f32[1,2048], index: 1, kind: input, shape index: {}]   ;;  %s142_s2 = inlined_call_operand.hbm [shape: f32[1,2048], index: 2, kind: output, shape index: {}]  }
   0x1   :  { %9 = vsyncpa [#allocation6], 0  ;;  %s96_s9 = smov [#allocation4]   ;;  %s48_s13 = scalar_lea.hbm %s141_s1, 256 }
   0x2   :  { %s16_s10 = sshll.u32 %s96_s9, 4  ;;  %p49_p0 = scmp.ne.s32.totalorder %s141_s1, %s48_s13  ;;  %s17_s10 = int_to_ptr.vmem [resolvable:$true] %s16_s10 }
   0x3   :  { %p52_p1 = scmp.lt.u32.totalorder %s48_s13, %s141_s1 }
   0x5   :  { %p54_p2 = pnand %p52_p1, %p49_p0 }
   0x7   :  { %57 = shalt.err (!%p54_p2)
}
   0x8   :  { %s58_s18 = scalar_lea.vmem %s17_s10, 256  ;;  %p63_p4 = scmp.lt.s32.totalorder %s17_s10, %s17_s10 }
   0x9   :  { %p59_p3 = scmp.ne.s32.totalorder %s17_s10, %s58_s18  ;;  %p64_p5 = scmp.lt.s32.totalorder %s58_s18, %s58_s18 }
   0xb   :  { %p65_p6 = por %p64_p5, %p63_p4 }
   0xd   :  { %p66_p7 = pnand %p65_p6, %p59_p3 }
   0xf   :  { %69 = shalt.err (!%p66_p7)
}
  0x10   :  { %19 = dma.hbm_to_vmem [thread:$0]  %s141_s1, 256, %s17_s10, [#allocation5]  }
  0x11   :  { %92 = dma.done.wait [#allocation5], 256  }
  0x12   :  { %93 = vsyncadd [#allocation5], 4294967040  ;;  %v26_v0 = vstv %s140_s0  ;;  %s97_s23 = smov [#allocation7]   ;;  %v24_v1 = vld [vmem:[#allocation4] sm:$0xff]  ;;  %v25_v2 = vld [vmem:[#allocation4 + $0x8] sm:$0xff] }
  0x13   :  { %s37_s24 = sshll.u32 %s97_s23, 4  ;;  %v27_v3 = vmul.f32 %v26_v0, %v24_v1  ;;  %v28_v4 = vmul.f32 %v26_v0, %v25_v2  ;;  %s38_s24 = int_to_ptr.vmem [resolvable:$true] %s37_s24 }
  0x14   :  { %s70_s25 = scalar_lea.vmem %s38_s24, 256  ;;  %p75_p9 = scmp.lt.s32.totalorder %s38_s24, %s38_s24 }
  0x15   :  { %29 = vst [vmem:[#allocation7] sm:$0xff] %v27_v3  ;;  %30 = vst [vmem:[#allocation7 + $0x8] sm:$0xff] %v28_v4  ;;  %p71_p8 = scmp.ne.s32.totalorder %s38_s24, %s70_s25  ;;  %p76_p10 = scmp.lt.s32.totalorder %s70_s25, %s70_s25 }
  0x17   :  { %p77_p11 = por %p76_p10, %p75_p9 }
  0x19   :  { %p78_p12 = pnand %p77_p11, %p71_p8 }
  0x1b   :  { %81 = shalt.err (!%p78_p12)
}
  0x1c   :  { %s82_s0 = scalar_lea.hbm %s142_s2, 256 }
  0x1d   :  { %p83_p13 = scmp.ne.s32.totalorder %s142_s2, %s82_s0  ;;  %p86_p0 = scmp.lt.u32.totalorder %s82_s0, %s142_s2 }
  0x1f   :  { %p88_p1 = pnand %p86_p0, %p83_p13 }
  0x21   :  { %91 = shalt.err (!%p88_p1)
}
  0x22   :  { %40 = dma.vmem_to_hbm [thread:$0]  %s38_s24, 256, %s142_s2, [#allocation6]  }
  0x23   :  { %94 = dma.done.wait [#allocation6], 256  }
  0x24   :  { %95 = vsyncadd [#allocation6], 4294967040 }
  0x25   :  { %44 = vsyncpa [#allocation5], 1 }
  0x26   :  { %45 = vsyncpa [#allocation6], 1 }

</bundles_post_ra>
